<compile_context>
chip_gen: v7x
topology: tpu7x:2x2x1
jax: 0.10.0
libtpu: 0.0.40
codegen_flags: <defaults>
</compile_context>

<pallas_src>
import functools

import jax
import jax.numpy as jnp
import numpy as np
from jax.experimental import pallas as pl
from jax.experimental.pallas import tpu as pltpu


_TM_CAP = 8192                 # max rows per grid step
_WIDTHS = (512, 256, 128)      # preferred lane-dense widths (must divide n)

# Loss-neutral padding values (yh_pad, y_pad) -> per-element loss == 0 (pad fallback only).
_EW_PAD = {
    "mse": (0.0, 0.0),
    "l1": (0.0, 0.0),
    "bce": (1.0, 1.0),               # -(1*log(1) + 0*clamp(log(0))) == 0
    "bce_with_logit": (200.0, 1.0),  # 200 - 200*1 + log1p(exp(-200)) == 0
}
_TRANSC_PER_ELEM = {"mse": 0, "l1": 0, "bce": 2, "bce_with_logit": 2,
                    "ce": 2, "nll": 0, None: 0}


def _round_up(x, m):
    return ((x + m - 1) // m) * m


def _cdiv(a, b):
    return -(-a // b)


def _row_granularity(dtypes):
    """Row-block granularity so (rows, lanes) blocks respect sublane packing."""
    g = 8
    for dt in dtypes:
        g = max(g, 32 // max(1, np.dtype(dt).itemsize))
    return g


# ---------------------------------------------------------------------------
# Hardware introspection & tile planning
# ---------------------------------------------------------------------------
@functools.lru_cache(maxsize=1)
def _hw():
    """Best-effort (per-core VMEM bytes, # TensorCores sharing one JAX device)."""
    kind = ""
    try:
        kind = jax.devices()[0].device_kind.lower()
    except Exception:
        pass
    vmem_cap = None
    try:
        v = getattr(pltpu.get_tpu_info(), "vmem_capacity_bytes", None)
        if isinstance(v, (int, np.integer)) and int(v) > 0:
            vmem_cap = int(v)
    except Exception:
        pass
    is_v7 = ("7" in kind) and not any(s in kind for s in ("v2", "v3", "v4", "v5", "v6"))
    if vmem_cap is None:
        vmem_cap = (64 << 20) if is_v7 else (128 << 20)
    if is_v7:
        vmem_cap = min(vmem_cap, 64 << 20)       # v7x VMEM is per-TensorCore
    ncores = 1
    try:
        nc = getattr(jax.devices()[0], "num_cores", None)
        if isinstance(nc, (int, np.integer)) and int(nc) in (1, 2):
            ncores = int(nc)
        elif is_v7 or any(s in kind for s in ("v4", "v5p")):
            ncores = 2                            # 2 TensorCores behind one device
    except Exception:
        pass
    return vmem_cap, ncores


def _vmem_budget(vmem_cap):
    if vmem_cap <= (96 << 20):                    # v7x-class: 64 MiB physical
        return max(16 << 20, min(52 << 20, vmem_cap - (12 << 20)))
    return min(100 << 20, vmem_cap - (28 << 20))  # v5e / v6e: 128 MiB physical


def _plan(rows, bytes_per_row, acc_fixed, acc_per_row, gran, max_tile_rows=None):
    """Pick (tile_rows, tiles_per_core, ncores, vmem_limit) for a row-tiled stream."""
    vmem_cap, ncores = _hw()
    budget = _vmem_budget(vmem_cap)
    tile_bytes = (8 << 20) if vmem_cap <= (96 << 20) else (16 << 20)

    if rows <= gran:
        # Tiny input: one block exactly covering every row ("equal full dim" rule).
        return rows, 1, 1, budget

    tm = min(_TM_CAP,
             max(1, tile_bytes // max(1, bytes_per_row)),
             max(1, (budget - acc_fixed) // max(1, 2 * bytes_per_row + acc_per_row)))
    if max_tile_rows is not None:
        tm = min(tm, int(max_tile_rows))
    tm = max(gran, min((tm // gran) * gran, (rows // gran) * gran))

    nblocks = _cdiv(rows, tm)
    if ncores > 1 and nblocks >= 2:
        nblocks = _round_up(nblocks, ncores)      # overshoot blocks handled in-kernel
    else:
        ncores = 1
    return tm, nblocks // ncores, ncores, budget


# ---------------------------------------------------------------------------
# Per-element loss functions (elementwise path)
# ---------------------------------------------------------------------------
def _ew_mse(yh, y):
    d = yh - y
    return d * d


def _ew_l1(yh, y):
    return jnp.abs(yh - y)


def _ew_bce(yh, y):
    # PyTorch BCELoss clamps the log terms at -100.
    return -(y * jnp.maximum(jnp.log(yh), -100.0)
             + (1.0 - y) * jnp.maximum(jnp.log(1.0 - yh), -100.0))


def _ew_bce_logit(x, y):
    # Numerically stable: max(x,0) - x*y + log1p(exp(-|x|))
    return jnp.maximum(x, 0.0) - x * y + jnp.log1p(jnp.exp(-jnp.abs(x)))


_EW_FNS = {"mse": _ew_mse, "l1": _ew_l1, "bce": _ew_bce, "bce_with_logit": _ew_bce_logit}


# ---------------------------------------------------------------------------
# Kernels
# ---------------------------------------------------------------------------
def _make_stream_kernel(per_elem, n_inputs, rows, tm, tiles_per_core, ncores, acc_rows):
    """Streaming sum of per_elem(*inputs) over row-tiled 2-D lane-dense arrays."""
    n_full = rows // tm                       # blocks that are guaranteed fully valid
    total_blocks = ncores * tiles_per_core    # grid blocks (may exceed real blocks by 1)

    def fold(loss):
        if acc_rows == tm:
            return loss
        # tile-aligned leading-dim reshape + leading-axis reduce: pure VPU adds.
        return jnp.sum(loss.reshape(tm // acc_rows, acc_rows, loss.shape[-1]), axis=0)

    def kernel(*refs):
        in_refs = refs[:n_inputs]
        out_ref = refs[n_inputs]
        acc_ref = refs[n_inputs + 1]
        c = pl.program_id(0)
        i = pl.program_id(1)
        g = c * tiles_per_core + i            # global (unclamped) block index

        @pl.when(i == 0)
        def _init():
            acc_ref[...] = jnp.zeros_like(acc_ref)

        def accumulate(masked):
            vals = [r[...].astype(jnp.float32) for r in in_refs]
            loss = per_elem(*vals)
            if masked:
                valid = rows - g * tm         # may be <= 0 for overshoot blocks
                rid = jax.lax.broadcasted_iota(jnp.int32, loss.shape, 0)
                loss = jnp.where(rid < valid, loss, 0.0)
            acc_ref[...] += fold(loss)

        if total_blocks <= n_full:
            accumulate(False)
        elif n_full == 0:
            accumulate(True)
        else:
            @pl.when(g < n_full)
            def _full():
                accumulate(False)

            @pl.when(g >= n_full)
            def _ragged():
                accumulate(True)

        @pl.when(i == tiles_per_core - 1)
        def _fin():
            out_ref[...] = jnp.broadcast_to(jnp.sum(acc_ref[...]), (1, 1))

    return kernel


def _classification_kernel(loss_type, rows, tm, tiles_per_core, ncores):
    """Cross-entropy / NLL over (tm, C) logits with int32 labels (tm, 1)."""
    n_full = rows // tm
    total_blocks = ncores * tiles_per_core

    def kernel(x_ref, lbl_ref, out_ref, acc_ref):
        c = pl.program_id(0)
        i = pl.program_id(1)
        g = c * tiles_per_core + i

        @pl.when(i == 0)
        def _init():
            acc_ref[...] = jnp.zeros_like(acc_ref)

        def accumulate(masked):
            x = x_ref[...].astype(jnp.float32)     # (tm, C)
            lbl = lbl_ref[...]                      # (tm, 1) int32
            if masked:
                valid = rows - g * tm               # may be <= 0 for overshoot blocks
                rid = jax.lax.broadcasted_iota(jnp.int32, lbl.shape, 0)
                lbl = jnp.where(rid < valid, lbl, -1)   # -1 never matches a class
            onehot = jax.lax.broadcasted_iota(jnp.int32, x.shape, 1) == lbl
            if loss_type == "ce":
                m = jnp.max(x, axis=-1, keepdims=True)
                lse = jnp.log(jnp.sum(jnp.exp(x - m), axis=-1, keepdims=True)) + m
                contrib = jnp.where(onehot, lse - x, 0.0)   # == -log_softmax at label
            else:  # 'nll': inputs are already log-probabilities
                contrib = jnp.where(onehot, -x, 0.0)
            # One non-zero per row -> fold classes each step into a (tm, 1) accumulator.
            acc_ref[...] += jnp.sum(contrib, axis=-1, keepdims=True)

        if total_blocks <= n_full:
            accumulate(False)
        elif n_full == 0:
            accumulate(True)
        else:
            @pl.when(g < n_full)
            def _full():
                accumulate(False)

            @pl.when(g >= n_full)
            def _ragged():
                accumulate(True)

        @pl.when(i == tiles_per_core - 1)
        def _fin():
            out_ref[...] = jnp.broadcast_to(jnp.sum(acc_ref[...]), (1, 1))

    return kernel


# ---------------------------------------------------------------------------
# pallas_call driver
# ---------------------------------------------------------------------------
def _scalar_reduce_call(kernel, arrays, tm, tiles_per_core, ncores, acc_shape,
                        vmem_limit, flops=0, transcendentals=0):
    """Row-tiled streaming reduction -> one f32 partial per core, summed in JAX."""
    rows = int(arrays[0].shape[0])
    last_block = max(0, _cdiv(rows, tm) - 1)

    def idx_map(c, i):
        # Clamp overshoot blocks (even round-up for the 2-core split) to the last real
        # block; the kernel masks their contribution to zero, so no OOB reads and no
        # double counting.
        return (jnp.minimum(c * tiles_per_core + i, last_block), 0)

    in_specs = [pl.BlockSpec((tm, int(a.shape[1])), idx_map) for a in arrays]
    bytes_accessed = int(sum(a.size * np.dtype(a.dtype).itemsize for a in arrays)
                         + 4 * ncores)

    partials = pl.pallas_call(
        kernel,
        out_shape=jax.ShapeDtypeStruct((ncores, 1), jnp.float32),
        grid_spec=pltpu.PrefetchScalarGridSpec(
            num_scalar_prefetch=0,
            grid=(ncores, tiles_per_core),
            in_specs=in_specs,
            out_specs=pl.BlockSpec((1, 1), lambda c, i: (c, 0)),
            scratch_shapes=[pltpu.VMEM(acc_shape, jnp.float32)],
        ),
        compiler_params=pltpu.CompilerParams(
            dimension_semantics=("parallel", "arbitrary"),
            vmem_limit_bytes=int(vmem_limit)),
        cost_estimate=pl.CostEstimate(
            flops=int(flops), transcendentals=int(transcendentals),
            bytes_accessed=bytes_accessed),
    )(*arrays)
    return jnp.sum(partials)


def _prep_elementwise(arrays, pad_vals):
    """Lane-dense (rows, W) view with NO copy when the element count divides a width."""
    n = int(arrays[0].size)
    w = next((c for c in _WIDTHS if n % c == 0), None)
    if w is not None:
        outs = [a.reshape(-1, w) for a in arrays]          # free row-major reshape
    else:
        w = 512
        total = _round_up(n, w)
        outs = [jnp.pad(a.reshape(-1), (0, total - n),
                        constant_values=pv).reshape(-1, w)
                for a, pv in zip(arrays, pad_vals)]
    return outs, int(outs[0].shape[0]), w


def _run_elementwise(per_elem, arrays, pad_vals, n_valid, transc_per_elem,
                     max_tile_rows=None):
    arrays2d, rows, w = _prep_elementwise(arrays, pad_vals)
    bytes_per_row = w * sum(np.dtype(a.dtype).itemsize for a in arrays2d)
    gran = _row_granularity([a.dtype for a in arrays2d])
    tm, tpc, ncores, vmem_limit = _plan(rows, bytes_per_row, acc_fixed=32 * w * 4,
                                        acc_per_row=0, gran=gran,
                                        max_tile_rows=max_tile_rows)
    acc_rows = 8 if tm % 8 == 0 else tm
    kernel = _make_stream_kernel(per_elem, len(arrays2d), rows, tm, tpc, ncores, acc_rows)
    return _scalar_reduce_call(kernel, arrays2d, tm, tpc, ncores,
                               acc_shape=(acc_rows, w), vmem_limit=vmem_limit,
                               flops=6 * n_valid,
                               transcendentals=transc_per_elem * n_valid)


# ---------------------------------------------------------------------------
# Wrapper (equivalent of Loss.forward)
# ---------------------------------------------------------------------------
def pallas_loss(loss_type, y_hat, y=None, reduction="sum", weight=None,
                max_tile_rows=None):
    """Forward pass of the PyTorch `Loss` module.

    loss_type in {'bce','bce_with_logit','mse','l1','ce','nll'} or None
    (None reproduces the `y_hat.mean()` fallback).
    """
    if weight is not None:
        raise NotImplementedError("weight is not supported")
    if reduction not in ("sum", "mean"):
        raise NotImplementedError("only reduction in {'sum','mean'} is supported")

    # ---------------- classification losses ----------------
    if loss_type in ("ce", "nll"):
        logits = y_hat
        if logits.ndim != 2:
            raise NotImplementedError("only (N, C) logits are supported")
        N, C = int(logits.shape[0]), int(logits.shape[1])
        labels = y.astype(jnp.int32).reshape(N, 1)         # the `y.long()` cast
        # VMEM footprint per row (class dim lane-padded, labels padded to 128 lanes).
        bytes_per_row = (_round_up(C, 128) * np.dtype(logits.dtype).itemsize + 128 * 4)
        gran = _row_granularity([logits.dtype, jnp.int32])
        tm, tpc, ncores, vmem_limit = _plan(N, bytes_per_row, acc_fixed=0,
                                            acc_per_row=512, gran=gran,
                                            max_tile_rows=max_tile_rows)
        kernel = _classification_kernel(loss_type, N, tm, tpc, ncores)
        total = _scalar_reduce_call(
            kernel, [logits, labels], tm, tpc, ncores,
            acc_shape=(tm, 1), vmem_limit=vmem_limit,
            flops=6 * N * C,
            transcendentals=_TRANSC_PER_ELEM[loss_type] * N * C)
        if reduction == "mean":
            total = total / N                # weight=None => denominator is N
        return total

    # ---------------- fallback: y_hat.mean() ----------------
    if loss_type is None:
        n = int(y_hat.size)
        total = _run_elementwise(lambda yh: yh, [y_hat], [0.0], n, 0, max_tile_rows)
        return total / n

    # ---------------- elementwise losses ----------------
    per_elem = _EW_FNS[loss_type]
    pad_yh, pad_y = _EW_PAD[loss_type]
    n = int(y_hat.size)
    total = _run_elementwise(per_elem, [y_hat, y], [pad_yh, pad_y], n,
                             _TRANSC_PER_ELEM[loss_type], max_tile_rows)
    if reduction == "mean":
        return total / n
    return total                              # reduction == 'sum' (module default)


# ---------------------------------------------------------------------------
# Demo / self-check
# ---------------------------------------------------------------------------
if __name__ == "__main__":
    key = jax.random.PRNGKey(0)
    k1, k2, k3, k4, k5, k6 = jax.random.split(key, 6)

    # Elementwise losses: NCHW-like tensors [2, 4, 16, 16] (2048 elems -> no padding).
    x = jax.random.normal(k1, (2, 4, 16, 16), jnp.float32)
    t = jax.random.normal(k2, (2, 4, 16, 16), jnp.float32)
    probs = jax.nn.sigmoid(x)            # valid (0,1) inputs for BCE
    targets01 = jax.nn.sigmoid(t)

    results = {}
    results["mse"] = pallas_loss("mse", x, t, reduction="sum")
    results["mse_mean"] = pallas_loss("mse", x, t, reduction="mean")
    results["l1"] = pallas_loss("l1", x, t, reduction="sum")
    results["bce"] = pallas_loss("bce", probs, targets01, reduction="sum")
    results["bcewl"] = pallas_loss("bce_with_logit", x, targets01, reduction="sum")
    results["fallback_mean"] = pallas_loss(None, x)

    # Native low-precision path (half the HBM bytes, no wrapper f32 cast).
    xb = x.astype(jnp.bfloat16)
    tb = t.astype(jnp.bfloat16)
    results["mse_bf16"] = pallas_loss("mse", xb, tb, reduction="sum")

    # Ragged row blocks handled in-kernel (no host-side pad): 6400 elems -> (25, 256);
    # a small tile cap forces multiple blocks with a partial last block.
    xr = jax.random.normal(k5, (2, 4, 50, 16), jnp.float32)
    tr = jax.random.normal(k6, (2, 4, 50, 16), jnp.float32)
    results["mse_ragged"] = pallas_loss("mse", xr, tr, max_tile_rows=8)

    # Element count not a multiple of 128 -> loss-neutral pad fallback path.
    xo = jax.random.normal(k1, (3, 5, 7, 11), jnp.float32)
    to = jax.random.normal(k2, (3, 5, 7, 11), jnp.float32)
    results["l1_odd"] = pallas_loss("l1", xo, to, reduction="sum")

    # Classification losses: logits [16, 32] and a ragged [19, 32] case.
    logits = jax.random.normal(k3, (16, 32), jnp.float32)
    labels = jax.random.randint(k4, (16,), 0, 32)
    results["ce"] = pallas_loss("ce", logits, labels, reduction="sum")
    results["ce_mean"] = pallas_loss("ce", logits, labels, reduction="mean")
    logp = jax.nn.log_softmax(logits, axis=-1)
    results["nll"] = pallas_loss("nll", logp, labels, reduction="sum")

    logits_r = jax.random.normal(k3, (19, 32), jnp.float32)
    labels_r = jax.random.randint(k4, (19,), 0, 32)
    results["ce_ragged"] = pallas_loss("ce", logits_r, labels_r, max_tile_rows=8)

    for v in results.values():
        jax.block_until_ready(v)

    def ok(a, b, tol=1e-4):
        return np.allclose(np.asarray(a, np.float64), np.asarray(b, np.float64),
                           rtol=tol, atol=tol)

    assert ok(results["mse"], jnp.sum((x - t) ** 2))
    assert ok(results["mse_mean"], jnp.mean((x - t) ** 2))
    assert ok(results["l1"], jnp.sum(jnp.abs(x - t)))
    assert ok(results["bce"],
              jnp.sum(-(targets01 * jnp.log(probs) + (1 - targets01) * jnp.log(1 - probs))))
    assert ok(results["bcewl"],
              jnp.sum(jnp.maximum(x, 0) - x * targets01 + jnp.log1p(jnp.exp(-jnp.abs(x)))))
    assert ok(results["fallback_mean"], jnp.mean(x))
    mse_bf16_ref = jnp.sum((xb.astype(jnp.float32) - tb.astype(jnp.float32)) ** 2)
    assert ok(results["mse_bf16"], mse_bf16_ref, tol=1e-3)
    assert ok(results["mse_ragged"], jnp.sum((xr - tr) ** 2))
    assert ok(results["l1_odd"], jnp.sum(jnp.abs(xo - to)))
    ce_ref = -jnp.sum(jax.nn.log_softmax(logits, -1)[jnp.arange(16), labels])
    assert ok(results["ce"], ce_ref)
    assert ok(results["ce_mean"], ce_ref / 16.0)
    assert ok(results["nll"], ce_ref)
    ce_r_ref = -jnp.sum(jax.nn.log_softmax(logits_r, -1)[jnp.arange(19), labels_r])
    assert ok(results["ce_ragged"], ce_r_ref)

    print("KERNEL_OK")
</pallas_src>

<mosaic_0001>
module attributes {stable_mosaic.version = 11 : i64} {
  func.func @kernel(%arg0: i32, %arg1: i32, %arg2: memref<4x512xf32, #tpu.memory_space<vmem>>, %arg3: memref<4x512xf32, #tpu.memory_space<vmem>>, %arg4: memref<1x1xf32, #tpu.memory_space<vmem>>, %arg5: memref<4x512xf32, #tpu.memory_space<vmem>>) attributes {dimension_semantics = [#tpu.dimension_semantics<parallel>, #tpu.dimension_semantics<arbitrary>], iteration_bounds = array<i64: 1, 1>, scalar_prefetch = 0 : i64, scratch_operands = 1 : i64, tpu.core_type = #tpu.core_type<tc>, window_params = [{transform_indices = @transform_0, window_bounds = array<i64: 4, 512>}, {transform_indices = @transform_1, window_bounds = array<i64: 4, 512>}, {transform_indices = @transform_2, window_bounds = array<i64: 1, 1>}]} {
    %c0_i32 = arith.constant 0 : i32
    %0 = arith.cmpi eq, %arg1, %c0_i32 : i32
    %1 = arith.extui %0 : i1 to i32
    %c0_i32_0 = arith.constant 0 : i32
    %2 = arith.cmpi ne, %1, %c0_i32_0 : i32
    scf.if %2 {
      %cst = arith.constant 0.000000e+00 : f32
      %13 = vector.broadcast %cst : f32 to vector<4x512xf32>
      %c0_10 = arith.constant 0 : index
      %c0_11 = arith.constant 0 : index
      %14 = vector.load %arg5[%c0_10, %c0_11] : memref<4x512xf32, #tpu.memory_space<vmem>>, vector<4x512xf32>
      tpu.vector_store %arg5[%c0_10, %c0_11], %13 {strides = array<i32>} : memref<4x512xf32, #tpu.memory_space<vmem>>, vector<4x512xf32>,
    } else {
    }
    %c0 = arith.constant 0 : index
    %c0_1 = arith.constant 0 : index
    %3 = vector.load %arg2[%c0, %c0_1] : memref<4x512xf32, #tpu.memory_space<vmem>>, vector<4x512xf32>
    %c0_2 = arith.constant 0 : index
    %c0_3 = arith.constant 0 : index
    %4 = vector.load %arg3[%c0_2, %c0_3] : memref<4x512xf32, #tpu.memory_space<vmem>>, vector<4x512xf32>
    %5 = arith.subf %3, %4 : vector<4x512xf32>
    %6 = arith.mulf %5, %5 : vector<4x512xf32>
    %c0_4 = arith.constant 0 : index
    %c0_5 = arith.constant 0 : index
    %7 = vector.load %arg5[%c0_4, %c0_5] : memref<4x512xf32, #tpu.memory_space<vmem>>, vector<4x512xf32>
    %8 = arith.addf %7, %6 : vector<4x512xf32>
    %c0_6 = arith.constant 0 : index
    %c0_7 = arith.constant 0 : index
    %9 = vector.load %arg5[%c0_6, %c0_7] : memref<4x512xf32, #tpu.memory_space<vmem>>, vector<4x512xf32>
    tpu.vector_store %arg5[%c0_6, %c0_7], %8 {strides = array<i32>} : memref<4x512xf32, #tpu.memory_space<vmem>>, vector<4x512xf32>,
    %c0_i32_8 = arith.constant 0 : i32
    %10 = arith.cmpi eq, %arg1, %c0_i32_8 : i32
    %11 = arith.extui %10 : i1 to i32
    %c0_i32_9 = arith.constant 0 : i32
    %12 = arith.cmpi ne, %11, %c0_i32_9 : i32
    scf.if %12 {
      %c0_10 = arith.constant 0 : index
      %c0_11 = arith.constant 0 : index
      %13 = vector.load %arg5[%c0_10, %c0_11] : memref<4x512xf32, #tpu.memory_space<vmem>>, vector<4x512xf32>
      %14 = vector.shape_cast %13 : vector<4x512xf32> to vector<1x4x512xf32>
      %cst = arith.constant dense<0.000000e+00> : vector<1xf32>
      %15 = vector.multi_reduction <add>, %14, %cst [1, 2] : vector<1x4x512xf32> to vector<1xf32>
      %16 = vector.shape_cast %15 : vector<1xf32> to vector<1x1x1xf32>
      %17 = vector.extract %16[0, 0, 0] : f32 from vector<1x1x1xf32>
      %18 = vector.broadcast %17 : f32 to vector<1x1xf32>
      %c0_12 = arith.constant 0 : index
      %c0_13 = arith.constant 0 : index
      %19 = vector.load %arg4[%c0_12, %c0_13] : memref<1x1xf32, #tpu.memory_space<vmem>>, vector<1x1xf32>
      tpu.vector_store %arg4[%c0_12, %c0_13], %18 {strides = array<i32>} : memref<1x1xf32, #tpu.memory_space<vmem>>, vector<1x1xf32>,
    } else {
    }
    return
  }
  func.func @transform_0(%arg0: i32, %arg1: i32) -> (i32, i32) {
    %c1_i32 = arith.constant 1 : i32
    %0 = arith.muli %arg0, %c1_i32 : i32
    %1 = arith.addi %0, %arg1 : i32
    %c0_i32 = arith.constant 0 : i32
    %2 = arith.minsi %1, %c0_i32 : i32
    %c0_i32_0 = arith.constant 0 : i32
    %c0_i32_1 = arith.constant 0 : i32
    return %2, %c0_i32_0 : i32, i32
  }
  func.func @transform_1(%arg0: i32, %arg1: i32) -> (i32, i32) {
    %c1_i32 = arith.constant 1 : i32
    %0 = arith.muli %arg0, %c1_i32 : i32
    %1 = arith.addi %0, %arg1 : i32
    %c0_i32 = arith.constant 0 : i32
    %2 = arith.minsi %1, %c0_i32 : i32
    %c0_i32_0 = arith.constant 0 : i32
    %c0_i32_1 = arith.constant 0 : i32
    return %2, %c0_i32_0 : i32, i32
  }
  func.func @transform_2(%arg0: i32, %arg1: i32) -> (i32, i32) {
    %c0_i32 = arith.constant 0 : i32
    %c0_i32_0 = arith.constant 0 : i32
    return %arg0, %c0_i32 : i32, i32
  }
}

</mosaic_0001>

<bundles_post_ra>
// kernel: tpu_custom_call.1
= control target key start
LH: loop header
LB: loop body
LE: loop exit
PB: predicated region body
PF: predicated region fallthrough
CT: control target
= control target key end

     0   :  { %7 = vsyncpa [#allocation4], 0  ;;  %s256_s0 = inlined_call_operand.hbm [shape: f32[4,512], index: 0, kind: input, shape index: {}]   ;;  %s257_s1 = inlined_call_operand.hbm [shape: f32[4,512], index: 1, kind: input, shape index: {}]   ;;  %s258_s2 = inlined_call_operand.hbm [shape: f32[1,1], index: 2, kind: output, shape index: {}]  }
   0x1   :  { %8 = vsyncpa [#allocation7], 0 }
   0x2   :  { %9 = vsyncpa [#allocation5], 0  ;;  %s202_s9 = smov [#allocation3]   ;;  %s203_s11 = smov [#allocation6]  }
   0x3   :  { %s22_s10 = sshll.u32 %s202_s9, 4  ;;  %s38_s12 = sshll.u32 %s203_s11, 4  ;;  %s23_s10 = int_to_ptr.vmem [resolvable:$true] %s22_s10  ;;  %s39_s12 = int_to_ptr.vmem [resolvable:$true] %s38_s12 }
   0x4   :  { %s130_s15 = scalar_lea.hbm %s256_s0, 256 }
   0x5   :  { %p131_p0 = scmp.ne.s32.totalorder %s256_s0, %s130_s15  ;;  %p134_p1 = scmp.lt.u32.totalorder %s130_s15, %s256_s0 }
   0x7   :  { %p136_p2 = pnand %p134_p1, %p131_p0 }
   0x9   :  { %139 = shalt.err (!%p136_p2)
}
   0xa   :  { %s140_s20 = scalar_lea.vmem %s23_s10, 256  ;;  %p145_p4 = scmp.lt.s32.totalorder %s23_s10, %s23_s10 }
   0xb   :  { %p141_p3 = scmp.ne.s32.totalorder %s23_s10, %s140_s20  ;;  %p146_p5 = scmp.lt.s32.totalorder %s140_s20, %s140_s20 }
   0xd   :  { %p147_p6 = por %p146_p5, %p145_p4 }
   0xf   :  { %p148_p7 = pnand %p147_p6, %p141_p3 }
  0x11   :  { %151 = shalt.err (!%p148_p7)
}
  0x12   :  { %25 = dma.hbm_to_vmem [thread:$0]  %s256_s0, 256, %s23_s10, [#allocation4]  }
  0x13   :  { %s152_s25 = scalar_lea.hbm %s257_s1, 256 }
  0x14   :  { %p153_p8 = scmp.ne.s32.totalorder %s257_s1, %s152_s25  ;;  %p156_p9 = scmp.lt.u32.totalorder %s152_s25, %s257_s1 }
  0x16   :  { %p158_p10 = pnand %p156_p9, %p153_p8 }
  0x18   :  { %161 = shalt.err (!%p158_p10)
}
  0x19   :  { %s162_s30 = scalar_lea.vmem %s39_s12, 256  ;;  %p167_p12 = scmp.lt.s32.totalorder %s39_s12, %s39_s12 }
  0x1a   :  { %p163_p11 = scmp.ne.s32.totalorder %s39_s12, %s162_s30  ;;  %p168_p13 = scmp.lt.s32.totalorder %s162_s30, %s162_s30 }
  0x1c   :  { %p169_p0 = por %p168_p13, %p167_p12 }
  0x1e   :  { %p170_p1 = pnand %p169_p0, %p163_p11 }
  0x20   :  { %173 = shalt.err (!%p170_p1)
}
  0x21   :  { %41 = dma.hbm_to_vmem [thread:$0]  %s257_s1, 256, %s39_s12, [#allocation7]  }
  0x22   :  { %196 = dma.done.wait [#allocation4], 256  }
  0x23   :  { %197 = vsyncadd [#allocation4], 4294967040 }
  0x24   :  { %198 = dma.done.wait [#allocation7], 256  }
  0x25   :  { %199 = vsyncadd [#allocation7], 4294967040  ;;  %v60_v0 = vld [vmem:[#allocation3] sm:$0xff]  ;;  %v61_v1 = vld [vmem:[#allocation3 + $0x8] sm:$0xff]  ;;  %vm85_vm0 = vcmask 1043456   ;;  %s204_s1 = smov [#allocation8]  }
  0x26   :  { %v62_v2 = vld [vmem:[#allocation6] sm:$0xff]  ;;  %v63_v3 = vld [vmem:[#allocation6 + $0x8] sm:$0xff]  ;;  %s111_s4 = sshll.u32 %s204_s1, 4  ;;  %vm103_vm1 = vcmask 0   ;;  %s112_s4 = int_to_ptr.vmem [resolvable:$true] %s111_s4 }
  0x27   :  { %v64_v4 = vsub.f32 %v60_v0, %v62_v2  ;;  %v65_v5 = vsub.f32 %v61_v1, %v63_v3  ;;  %s174_s6 = scalar_lea.vmem %s112_s4, 16  ;;  %s178_s7 = scalar_lea.vmem %s112_s4, 32 }
  0x28   :  { %p175_p2 = scmp.ne.s32.totalorder %s112_s4, %s174_s6  ;;  %p179_p3 = scmp.lt.s32.totalorder %s112_s4, %s112_s4 }
  0x29   :  { %v66_v6 = vmul.f32 %v64_v4, %v64_v4  ;;  %v67_v7 = vmul.f32 %v65_v5, %v65_v5  ;;  %p180_p4 = scmp.lt.s32.totalorder %s178_s7, %s174_s6 }
  0x2b   :  { %v81_v8 = vcombine.high %v66_v6, %v66_v6  ;;  %v86_v9 = vsel %vm85_vm0, %v66_v6, 0.0  ;;  %v82_v10 = vcombine.high %v67_v7, %v67_v7  ;;  %v89_v12 = vsel %vm85_vm0, %v67_v7, 0.0  ;;  %p181_p5 = por %p180_p4, %p179_p3 }
  0x2d   :  { %v87_v11 = vsel %vm85_vm0, %v81_v8, 0.0  ;;  %v91_v14 = vsel %vm85_vm0, %v82_v10, 0.0  ;;  %p182_p6 = pnand %p181_p5, %p175_p2 }
  0x2e   :  { %v88_v13 = vadd.f32 %v87_v11, %v86_v9 }
  0x30   :  { %v90_v15 = vadd.f32 %v89_v12, %v88_v13 }
  0x32   :  { %v92_v16 = vadd.f32 %v91_v14, %v90_v15 }
  0x34   :  { %93 = vadd.xlane.f32.xlu0 %v92_v16 }
  0xc1   :  { %v94_v17 = vpop.xlane.xlu0 %93 }
  0xc2   :  { %v95_v18 = vrot.slane %v94_v17, 4 }
  0xc4   :  { %v96_v19 = vadd.f32 %v95_v18, %v94_v17 }
  0xc6   :  { %v97_v20 = vrot.slane %v96_v19, 2 }
  0xc8   :  { %v98_v21 = vadd.f32 %v97_v20, %v96_v19 }
  0xca   :  { %v99_v22 = vrot.slane %v98_v21, 1 }
  0xcc   :  { %v100_v23 = vadd.f32 %v99_v22, %v98_v21 }
  0xce   :  { %125 = vpush %v100_v23 }
  0xff   :  { %s126_s5 = spop %125 }
 0x100   :  { %v102_v24 = vstv %s126_s5 }
 0x101   :  { %104 = vst.msk [vmem:[#allocation8] sm:$0x1] %vm103_vm1, %v102_v24 }
 0x102   :  { %185 = shalt.err (!%p182_p6)
}
 0x103   :  { %s186_s10 = scalar_lea.hbm %s258_s2, 16 }
 0x104   :  { %p187_p7 = scmp.ne.s32.totalorder %s258_s2, %s186_s10  ;;  %p190_p8 = scmp.lt.u32.totalorder %s186_s10, %s258_s2 }
 0x106   :  { %p192_p9 = pnand %p190_p8, %p187_p7 }
 0x108   :  { %195 = shalt.err (!%p192_p9)
}
 0x109   :  { %114 = dma.vmem_to_hbm [thread:$0]  %s112_s4, 16, %s258_s2, [#allocation5]  }
 0x10a   :  { %200 = dma.done.wait [#allocation5], 16  }
 0x10b   :  { %201 = vsyncadd [#allocation5], 4294967280 }
 0x10c   :  { %118 = vsyncpa [#allocation4], 1 }
 0x10d   :  { %119 = vsyncpa [#allocation7], 1 }
 0x10e   :  { %120 = vsyncpa [#allocation5], 1 }

</bundles_post_ra>
